<compile_context>
chip_gen: v7x
topology: tpu7x:2x2x1
jax: 0.10.0
libtpu: 0.0.40
codegen_flags: <defaults>
</compile_context>

<pallas_src>
import math

import jax
import jax.numpy as jnp
from jax import lax
from jax.experimental import pallas as pl
from jax.experimental.pallas import tpu as pltpu


# ---------------------------------------------------------------------------
# helpers
# ---------------------------------------------------------------------------
def _round_up(x: int, m: int) -> int:
    return ((x + m - 1) // m) * m


# ---------------------------------------------------------------------------
# kernels
# ---------------------------------------------------------------------------
def _lstm_query_kernel(x_ref, len_ref, w_ih_ref, w_hh_ref, b_ref,
                       wq_ref, bq_ref, o_ref, h_sc, c_sc):
    """One grid step == one timestep of a masked unidirectional LSTM.

    x_ref   : (1, N, De)   timestep t of the query features
    len_ref : (N, 1) int32 valid lengths (prefix masks)
    w_ih    : (De, 4H), w_hh: (H, 4H), b: (1, 4H)   gate order [i, f, g, o]
    wq/bq   : final query linear (fused epilogue)
    o_ref   : (N, Do)      L2-normalized query embedding (written on last step)
    h_sc/c_sc: (N, H) VMEM scratch carried across grid steps.
    """
    t = pl.program_id(0)
    hidden = h_sc.shape[-1]

    @pl.when(t == 0)
    def _():
        h_sc[...] = jnp.zeros_like(h_sc)
        c_sc[...] = jnp.zeros_like(c_sc)

    x_t = x_ref[0]                                             # (N, De)
    gates = (jnp.dot(x_t, w_ih_ref[...], preferred_element_type=jnp.float32)
             + jnp.dot(h_sc[...], w_hh_ref[...], preferred_element_type=jnp.float32)
             + b_ref[...])
    i_g = jax.nn.sigmoid(gates[:, 0 * hidden:1 * hidden])
    f_g = jax.nn.sigmoid(gates[:, 1 * hidden:2 * hidden])
    g_g = jnp.tanh(gates[:, 2 * hidden:3 * hidden])
    o_g = jax.nn.sigmoid(gates[:, 3 * hidden:4 * hidden])
    c_new = f_g * c_sc[...] + i_g * g_g
    h_new = o_g * jnp.tanh(c_new)

    # TODO(synk): pack_padded_sequence / sorting has no Pallas equivalent; the
    # length-gated recurrence matches PyTorch only for prefix-valid masks.
    m = (len_ref[...] > t).astype(jnp.float32)                 # (N, 1)
    c_sc[...] = m * c_new + (1.0 - m) * c_sc[...]
    h_sc[...] = m * h_new + (1.0 - m) * h_sc[...]

    @pl.when(t == pl.num_programs(0) - 1)
    def _():
        y = jnp.dot(h_sc[...], wq_ref[...],
                    preferred_element_type=jnp.float32) + bq_ref[...]
        ssq = jnp.sum(y * y, axis=-1, keepdims=True)
        o_ref[...] = (y * lax.rsqrt(jnp.maximum(ssq, 1e-24))).astype(o_ref.dtype)


def _moment_dist_kernel(feat_ref, mw_ref, q_ref, w1_ref, b1_ref, w2_ref, b2_ref,
                        o_ref, pooled_sc):
    """Fused moment MLP + L2-norm + masked pairwise distance.

    grid = (S, row_tiles):  s = moment set (pos/intra/inter), j = row tile.
    feat_ref : (1, Rt, Dv)   flattened (N*Lc) clip features of set s, tile j
    mw_ref   : (1, N, Rt)    block-diag mask/den matrix (mask[n,l]/sum(mask[n]))
    q_ref    : (N, Do)       unit-norm query embeddings
    o_ref    : (1, N, 1)     per-row distance for set s
    pooled_sc: (N, Do)       mask-weighted pooled moment embedding accumulator
    """
    j = pl.program_id(1)

    @pl.when(j == 0)
    def _():
        pooled_sc[...] = jnp.zeros_like(pooled_sc)

    x = feat_ref[0]                                            # (Rt, Dv)
    h = jnp.maximum(
        jnp.dot(x, w1_ref[...], preferred_element_type=jnp.float32) + b1_ref[...],
        0.0)
    y = jnp.dot(h, w2_ref[...], preferred_element_type=jnp.float32) + b2_ref[...]
    ssq = jnp.sum(y * y, axis=-1, keepdims=True)
    me = y * lax.rsqrt(jnp.maximum(ssq, 1e-24))                # unit rows (Rt, Do)
    # mask-weighted pool per query row, MXU matmul:
    pooled_sc[...] += jnp.dot(mw_ref[0], me, preferred_element_type=jnp.float32)

    @pl.when(j == pl.num_programs(1) - 1)
    def _():
        # ||m - q||^2 = 2 - 2 m.q  (both unit-norm); mask-weighted mean folded
        # into the pooled embedding already.
        num = jnp.sum(pooled_sc[...] * q_ref[...], axis=-1, keepdims=True)  # (N,1)
        o_ref[0] = 2.0 - 2.0 * num


# ---------------------------------------------------------------------------
# CAL module
# ---------------------------------------------------------------------------
class CALConfig:
    def __init__(self, visual_input_size=128, visual_hidden_size=128,
                 output_size=128, embedding_size=128, lstm_hidden_size=128,
                 margin=0.2, inter_loss_weight=0.5, loss_type="hinge"):
        self.visual_input_size = visual_input_size
        self.visual_hidden_size = visual_hidden_size
        self.output_size = output_size
        self.embedding_size = embedding_size
        self.lstm_hidden_size = lstm_hidden_size
        self.margin = margin
        self.inter_loss_weight = inter_loss_weight
        self.loss_type = loss_type


class CALPallas:
    def __init__(self, config, key):
        self.config = config
        c = config
        keys = jax.random.split(key, 7)

        def linear_init(k, fan_in, fan_out):
            bound = 1.0 / math.sqrt(fan_in)
            kw, kb = jax.random.split(k)
            w = jax.random.uniform(kw, (fan_in, fan_out), jnp.float32, -bound, bound)
            b = jax.random.uniform(kb, (fan_out,), jnp.float32, -bound, bound)
            return w, b

        # moment_mlp: Linear(Dv, Hv) -> ReLU -> Linear(Hv, Do)
        self.w1, self.b1 = linear_init(keys[0], c.visual_input_size, c.visual_hidden_size)
        self.w2, self.b2 = linear_init(keys[1], c.visual_hidden_size, c.output_size)
        # query LSTM (1 layer, unidirectional), gate order [i, f, g, o]
        h = c.lstm_hidden_size
        bound = 1.0 / math.sqrt(h)
        self.w_ih = jax.random.uniform(keys[2], (c.embedding_size, 4 * h), jnp.float32, -bound, bound)
        self.w_hh = jax.random.uniform(keys[3], (h, 4 * h), jnp.float32, -bound, bound)
        b_ih = jax.random.uniform(keys[4], (4 * h,), jnp.float32, -bound, bound)
        b_hh = jax.random.uniform(keys[5], (4 * h,), jnp.float32, -bound, bound)
        self.b_lstm = b_ih + b_hh
        # query_linear: Linear(H, Do)
        self.wq, self.bq = linear_init(keys[6], h, c.output_size)

    # --- query encoder: fused LSTM + linear + L2-norm ----------------------
    def query_encoder(self, query_feat, query_mask):
        n, lq, de = query_feat.shape
        h = self.config.lstm_hidden_size
        do = self.config.output_size
        x = jnp.transpose(query_feat.astype(jnp.float32), (1, 0, 2))   # (Lq, N, De)
        lens = jnp.sum(query_mask.astype(jnp.float32), axis=1)
        lens = lens.astype(jnp.int32).reshape(n, 1)                    # (N, 1)
        return pl.pallas_call(
            _lstm_query_kernel,
            out_shape=jax.ShapeDtypeStruct((n, do), jnp.float32),
            grid_spec=pltpu.PrefetchScalarGridSpec(
                num_scalar_prefetch=0,
                grid=(lq,),
                in_specs=[
                    pl.BlockSpec((1, n, de), lambda t: (t, 0, 0)),      # x_t
                    pl.BlockSpec((n, 1), lambda t: (0, 0)),             # lengths
                    pl.BlockSpec((de, 4 * h), lambda t: (0, 0)),        # W_ih
                    pl.BlockSpec((h, 4 * h), lambda t: (0, 0)),         # W_hh
                    pl.BlockSpec((1, 4 * h), lambda t: (0, 0)),         # b
                    pl.BlockSpec((h, do), lambda t: (0, 0)),            # Wq
                    pl.BlockSpec((1, do), lambda t: (0, 0)),            # bq
                ],
                out_specs=pl.BlockSpec((n, do), lambda t: (0, 0)),
                scratch_shapes=[pltpu.VMEM((n, h), jnp.float32),
                                pltpu.VMEM((n, h), jnp.float32)],
            ),
            compiler_params=pltpu.CompilerParams(
                dimension_semantics=("arbitrary",)),
        )(x, lens, self.w_ih, self.w_hh, self.b_lstm.reshape(1, 4 * h),
          self.wq, self.bq.reshape(1, do))

    # --- fused moment encoder + masked pairwise distance (all sets) --------
    def _moment_dists(self, q_emb, feats, masks, *, max_row_tile=512):
        s_sets = len(feats)
        n, do = q_emb.shape
        dv = feats[0].shape[-1]
        lc = max(int(f.shape[1]) for f in feats)
        feats = [f if f.shape[1] == lc
                 else jnp.pad(f, ((0, 0), (0, lc - f.shape[1]), (0, 0))) for f in feats]
        masks = [m if m.shape[1] == lc
                 else jnp.pad(m, ((0, 0), (0, lc - m.shape[1]))) for m in masks]
        feat = jnp.stack(feats, 0).astype(jnp.float32).reshape(s_sets, n * lc, dv)
        mask = jnp.stack(masks, 0).astype(jnp.float32)                   # (S, N, Lc)

        # mask / sum(mask) folded into a block-diagonal aggregation matrix so
        # the masked mean becomes a single MXU matmul inside the kernel.
        den = jnp.maximum(jnp.sum(mask, axis=-1, keepdims=True), 1e-6)   # (S, N, 1)
        wmask = mask / den                                               # (S, N, Lc)
        eye = jnp.eye(n, dtype=jnp.float32)
        mw = (eye[None, :, :, None] * wmask[:, None, :, :]).reshape(s_sets, n, n * lc)

        rows = n * lc
        rows_pad = _round_up(rows, 8)
        rt = min(rows_pad, max_row_tile)
        rows_pad = _round_up(rows_pad, rt)
        if rows_pad != rows:
            feat = jnp.pad(feat, ((0, 0), (0, rows_pad - rows), (0, 0)))
            mw = jnp.pad(mw, ((0, 0), (0, 0), (0, rows_pad - rows)))

        hv = self.w1.shape[1]
        out = pl.pallas_call(
            _moment_dist_kernel,
            out_shape=jax.ShapeDtypeStruct((s_sets, n, 1), jnp.float32),
            grid_spec=pltpu.PrefetchScalarGridSpec(
                num_scalar_prefetch=0,
                grid=(s_sets, rows_pad // rt),
                in_specs=[
                    pl.BlockSpec((1, rt, dv), lambda s, j: (s, j, 0)),   # clip feats
                    pl.BlockSpec((1, n, rt), lambda s, j: (s, 0, j)),    # mask matrix
                    pl.BlockSpec((n, do), lambda s, j: (0, 0)),          # query emb
                    pl.BlockSpec((dv, hv), lambda s, j: (0, 0)),         # W1
                    pl.BlockSpec((1, hv), lambda s, j: (0, 0)),          # b1
                    pl.BlockSpec((hv, do), lambda s, j: (0, 0)),         # W2
                    pl.BlockSpec((1, do), lambda s, j: (0, 0)),          # b2
                ],
                out_specs=pl.BlockSpec((1, n, 1), lambda s, j: (s, 0, 0)),
                scratch_shapes=[pltpu.VMEM((n, do), jnp.float32)],
            ),
            compiler_params=pltpu.CompilerParams(
                dimension_semantics=("parallel", "arbitrary")),
        )(feat, mw, q_emb.astype(jnp.float32),
          self.w1, self.b1.reshape(1, hv), self.w2, self.b2.reshape(1, do))
        return out[:, :, 0]                                              # (S, N)

    # --- loss (tiny reduce -> plain JAX) ------------------------------------
    def _calc_loss(self, pos_dist, neg_dist):
        n = pos_dist.shape[0]
        if self.config.loss_type == "hinge":
            return jnp.sum(jnp.maximum(self.config.margin + pos_dist - neg_dist, 0.0)) / n
        elif self.config.loss_type == "lse":
            return jnp.sum(jnp.log1p(jnp.exp(pos_dist - neg_dist))) / n
        else:
            raise NotImplementedError("Only support 'hinge' and 'lse'")

    def __call__(self, query_feat, query_mask,
                 pos_moment_feat, pos_moment_mask,
                 intra_neg_moment_feat, intra_neg_moment_mask,
                 inter_neg_moment_feat, inter_neg_moment_mask):
        query_embed = self.query_encoder(query_feat, query_mask)
        if self.config.inter_loss_weight == 0:
            feats = [pos_moment_feat, intra_neg_moment_feat]
            masks = [pos_moment_mask, intra_neg_moment_mask]
        else:
            feats = [pos_moment_feat, intra_neg_moment_feat, inter_neg_moment_feat]
            masks = [pos_moment_mask, intra_neg_moment_mask, inter_neg_moment_mask]
        dists = self._moment_dists(query_embed, feats, masks)   # (S, N)
        loss = self._calc_loss(dists[0], dists[1])
        if self.config.inter_loss_weight != 0:
            loss = loss + self.config.inter_loss_weight * self._calc_loss(dists[0], dists[2])
        return loss


# ---------------------------------------------------------------------------
# pure-JAX reference for correctness checking
# ---------------------------------------------------------------------------
def _reference_loss(model, cfg, query_feat, query_mask,
                    pos_feat, pos_mask, intra_feat, intra_mask,
                    inter_feat, inter_mask):
    hi = jax.lax.Precision.HIGHEST

    def l2norm(x):
        nrm = jnp.sqrt(jnp.sum(x * x, axis=-1, keepdims=True))
        return x / jnp.maximum(nrm, 1e-12)

    def moment_enc(feat):
        h = jnp.maximum(jnp.dot(feat, model.w1, precision=hi) + model.b1, 0.0)
        return l2norm(jnp.dot(h, model.w2, precision=hi) + model.b2)

    n, lq, _ = query_feat.shape
    hdim = cfg.lstm_hidden_size
    x_proj = jnp.dot(query_feat, model.w_ih, precision=hi) + model.b_lstm

    def step(carry, inp):
        h, c = carry
        xp_t, m_t = inp
        g = xp_t + jnp.dot(h, model.w_hh, precision=hi)
        i = jax.nn.sigmoid(g[:, :hdim])
        f = jax.nn.sigmoid(g[:, hdim:2 * hdim])
        gg = jnp.tanh(g[:, 2 * hdim:3 * hdim])
        o = jax.nn.sigmoid(g[:, 3 * hdim:])
        c_new = f * c + i * gg
        h_new = o * jnp.tanh(c_new)
        m = m_t[:, None]
        return (m * h_new + (1 - m) * h, m * c_new + (1 - m) * c), None

    init = (jnp.zeros((n, hdim), jnp.float32), jnp.zeros((n, hdim), jnp.float32))
    (h_fin, _), _ = jax.lax.scan(step, init, (x_proj.transpose(1, 0, 2), query_mask.T))
    q_emb = l2norm(jnp.dot(h_fin, model.wq, precision=hi) + model.bq)

    def pdist(feat, mask):
        me = moment_enc(feat)
        d = jnp.sum((me - q_emb[:, None, :]) ** 2, axis=-1)
        return jnp.sum(d * mask, axis=1) / jnp.sum(mask, axis=1)

    def calc(p, ng):
        if cfg.loss_type == "hinge":
            return jnp.sum(jnp.maximum(cfg.margin + p - ng, 0.0)) / p.shape[0]
        return jnp.sum(jnp.log1p(jnp.exp(p - ng))) / p.shape[0]

    pos_d = pdist(pos_feat, pos_mask)
    intra_d = pdist(intra_feat, intra_mask)
    loss = calc(pos_d, intra_d)
    if cfg.inter_loss_weight != 0:
        inter_d = pdist(inter_feat, inter_mask)
        loss = loss + cfg.inter_loss_weight * calc(pos_d, inter_d)
    return loss


# ---------------------------------------------------------------------------
# demo / self-test
# ---------------------------------------------------------------------------
if __name__ == "__main__":
    key = jax.random.PRNGKey(0)
    cfg = CALConfig()          # all feature dims 128 (lane-dense), hinge loss
    N, Lq, Lc = 4, 8, 6

    k_param, k_q, k_pos, k_intra, k_inter = jax.random.split(key, 5)
    model = CALPallas(cfg, k_param)

    def prefix_mask(lengths, max_len):
        ar = jnp.arange(max_len)[None, :]
        return (ar < jnp.asarray(lengths)[:, None]).astype(jnp.float32)

    query_feat = jax.random.normal(k_q, (N, Lq, cfg.embedding_size), jnp.float32)
    query_mask = prefix_mask([8, 5, 3, 6], Lq)
    pos_feat = jax.random.normal(k_pos, (N, Lc, cfg.visual_input_size), jnp.float32)
    pos_mask = prefix_mask([6, 4, 5, 3], Lc)
    intra_feat = jax.random.normal(k_intra, (N, Lc, cfg.visual_input_size), jnp.float32)
    intra_mask = prefix_mask([5, 6, 2, 4], Lc)
    inter_feat = jax.random.normal(k_inter, (N, Lc, cfg.visual_input_size), jnp.float32)
    inter_mask = prefix_mask([3, 6, 4, 5], Lc)

    loss = jax.block_until_ready(
        model(query_feat, query_mask, pos_feat, pos_mask,
              intra_feat, intra_mask, inter_feat, inter_mask))

    ref = jax.block_until_ready(
        _reference_loss(model, cfg, query_feat, query_mask,
                        pos_feat, pos_mask, intra_feat, intra_mask,
                        inter_feat, inter_mask))

    assert loss.shape == (), loss.shape
    assert bool(jnp.isfinite(loss)), "non-finite loss"
    assert jnp.allclose(loss, ref, rtol=5e-3, atol=5e-3), (loss, ref)
    print("KERNEL_OK")
</pallas_src>

<mosaic_0001>
module attributes {stable_mosaic.version = 11 : i64} {
  func.func @_lstm_query_kernel(%arg0: i32, %arg1: memref<1x4x128xf32, #tpu.memory_space<vmem>>, %arg2: memref<4x1xi32, #tpu.memory_space<vmem>>, %arg3: memref<128x512xf32, #tpu.memory_space<vmem>>, %arg4: memref<128x512xf32, #tpu.memory_space<vmem>>, %arg5: memref<1x512xf32, #tpu.memory_space<vmem>>, %arg6: memref<128x128xf32, #tpu.memory_space<vmem>>, %arg7: memref<1x128xf32, #tpu.memory_space<vmem>>, %arg8: memref<4x128xf32, #tpu.memory_space<vmem>>, %arg9: memref<4x128xf32, #tpu.memory_space<vmem>>, %arg10: memref<4x128xf32, #tpu.memory_space<vmem>>) attributes {dimension_semantics = [#tpu.dimension_semantics<arbitrary>], iteration_bounds = array<i64: 8>, scalar_prefetch = 0 : i64, scratch_operands = 2 : i64, tpu.core_type = #tpu.core_type<tc>, window_params = [{transform_indices = @transform_0, window_bounds = array<i64: 1, 4, 128>}, {pipeline_mode = #tpu.pipeline_mode<synchronous>, transform_indices = @transform_1, window_bounds = array<i64: 4, 1>}, {pipeline_mode = #tpu.pipeline_mode<synchronous>, transform_indices = @transform_2, window_bounds = array<i64: 128, 512>}, {pipeline_mode = #tpu.pipeline_mode<synchronous>, transform_indices = @transform_3, window_bounds = array<i64: 128, 512>}, {pipeline_mode = #tpu.pipeline_mode<synchronous>, transform_indices = @transform_4, window_bounds = array<i64: 1, 512>}, {pipeline_mode = #tpu.pipeline_mode<synchronous>, transform_indices = @transform_5, window_bounds = array<i64: 128, 128>}, {pipeline_mode = #tpu.pipeline_mode<synchronous>, transform_indices = @transform_6, window_bounds = array<i64: 1, 128>}, {pipeline_mode = #tpu.pipeline_mode<synchronous>, transform_indices = @transform_7, window_bounds = array<i64: 4, 128>}]} {
    %c0_i32 = arith.constant 0 : i32
    %0 = arith.cmpi eq, %arg0, %c0_i32 : i32
    %1 = arith.extui %0 : i1 to i32
    %c0_i32_0 = arith.constant 0 : i32
    %2 = arith.cmpi ne, %1, %c0_i32_0 : i32
    scf.if %2 {
      %cst_30 = arith.constant 0.000000e+00 : f32
      %66 = vector.broadcast %cst_30 : f32 to vector<4x128xf32>
      %c0_31 = arith.constant 0 : index
      %c0_32 = arith.constant 0 : index
      %67 = vector.load %arg9[%c0_31, %c0_32] : memref<4x128xf32, #tpu.memory_space<vmem>>, vector<4x128xf32>
      tpu.vector_store %arg9[%c0_31, %c0_32], %66 {strides = array<i32>} : memref<4x128xf32, #tpu.memory_space<vmem>>, vector<4x128xf32>,
      %cst_33 = arith.constant 0.000000e+00 : f32
      %68 = vector.broadcast %cst_33 : f32 to vector<4x128xf32>
      %c0_34 = arith.constant 0 : index
      %c0_35 = arith.constant 0 : index
      %69 = vector.load %arg10[%c0_34, %c0_35] : memref<4x128xf32, #tpu.memory_space<vmem>>, vector<4x128xf32>
      tpu.vector_store %arg10[%c0_34, %c0_35], %68 {strides = array<i32>} : memref<4x128xf32, #tpu.memory_space<vmem>>, vector<4x128xf32>,
    } else {
    }
    %c0 = arith.constant 0 : index
    %c0_1 = arith.constant 0 : index
    %c0_2 = arith.constant 0 : index
    %3 = vector.load %arg1[%c0, %c0_1, %c0_2] : memref<1x4x128xf32, #tpu.memory_space<vmem>>, vector<1x4x128xf32>
    %4 = vector.shape_cast %3 : vector<1x4x128xf32> to vector<4x128xf32>
    %c0_3 = arith.constant 0 : index
    %c0_4 = arith.constant 0 : index
    %5 = vector.load %arg3[%c0_3, %c0_4] : memref<128x512xf32, #tpu.memory_space<vmem>>, vector<128x512xf32>
    %cst = arith.constant dense<0.000000e+00> : vector<4x512xf32>
    %6 = tpu.matmul %4, %5, %cst {dimension_numbers = #tpu.dot_dimension_numbers<[1], [0], [0], [1], [0, 0, 1, 1], [], []>} : vector<4x128xf32>, vector<128x512xf32>, vector<4x512xf32> -> vector<4x512xf32>
    %c0_5 = arith.constant 0 : index
    %c0_6 = arith.constant 0 : index
    %7 = vector.load %arg9[%c0_5, %c0_6] : memref<4x128xf32, #tpu.memory_space<vmem>>, vector<4x128xf32>
    %c0_7 = arith.constant 0 : index
    %c0_8 = arith.constant 0 : index
    %8 = vector.load %arg4[%c0_7, %c0_8] : memref<128x512xf32, #tpu.memory_space<vmem>>, vector<128x512xf32>
    %cst_9 = arith.constant dense<0.000000e+00> : vector<4x512xf32>
    %9 = tpu.matmul %7, %8, %cst_9 {dimension_numbers = #tpu.dot_dimension_numbers<[1], [0], [0], [1], [0, 0, 1, 1], [], []>} : vector<4x128xf32>, vector<128x512xf32>, vector<4x512xf32> -> vector<4x512xf32>
    %10 = arith.addf %6, %9 : vector<4x512xf32>
    %c0_10 = arith.constant 0 : index
    %c0_11 = arith.constant 0 : index
    %11 = vector.load %arg5[%c0_10, %c0_11] : memref<1x512xf32, #tpu.memory_space<vmem>>, vector<1x512xf32>
    %12 = vector.broadcast %11 : vector<1x512xf32> to vector<4x512xf32>
    %13 = arith.addf %10, %12 : vector<4x512xf32>
    %14 = vector.extract_strided_slice %13 {offsets = [0, 0], sizes = [4, 128], strides = [1, 1]} : vector<4x512xf32> to vector<4x128xf32>
    %15 = arith.negf %14 : vector<4x128xf32>
    %16 = math.exp %15 : vector<4x128xf32>
    %cst_12 = arith.constant 1.000000e+00 : f32
    %17 = vector.broadcast %cst_12 : f32 to vector<4x128xf32>
    %18 = arith.addf %17, %16 : vector<4x128xf32>
    %19 = arith.divf %17, %18 : vector<4x128xf32>
    %20 = vector.extract_strided_slice %13 {offsets = [0, 128], sizes = [4, 128], strides = [1, 1]} : vector<4x512xf32> to vector<4x128xf32>
    %21 = arith.negf %20 : vector<4x128xf32>
    %22 = math.exp %21 : vector<4x128xf32>
    %cst_13 = arith.constant 1.000000e+00 : f32
    %23 = vector.broadcast %cst_13 : f32 to vector<4x128xf32>
    %24 = arith.addf %23, %22 : vector<4x128xf32>
    %25 = arith.divf %23, %24 : vector<4x128xf32>
    %26 = vector.extract_strided_slice %13 {offsets = [0, 256], sizes = [4, 128], strides = [1, 1]} : vector<4x512xf32> to vector<4x128xf32>
    %27 = math.tanh %26 : vector<4x128xf32>
    %28 = vector.extract_strided_slice %13 {offsets = [0, 384], sizes = [4, 128], strides = [1, 1]} : vector<4x512xf32> to vector<4x128xf32>
    %29 = arith.negf %28 : vector<4x128xf32>
    %30 = math.exp %29 : vector<4x128xf32>
    %cst_14 = arith.constant 1.000000e+00 : f32
    %31 = vector.broadcast %cst_14 : f32 to vector<4x128xf32>
    %32 = arith.addf %31, %30 : vector<4x128xf32>
    %33 = arith.divf %31, %32 : vector<4x128xf32>
    %c0_15 = arith.constant 0 : index
    %c0_16 = arith.constant 0 : index
    %34 = vector.load %arg10[%c0_15, %c0_16] : memref<4x128xf32, #tpu.memory_space<vmem>>, vector<4x128xf32>
    %35 = arith.mulf %25, %34 : vector<4x128xf32>
    %36 = arith.mulf %19, %27 : vector<4x128xf32>
    %37 = arith.addf %35, %36 : vector<4x128xf32>
    %38 = math.tanh %37 : vector<4x128xf32>
    %39 = arith.mulf %33, %38 : vector<4x128xf32>
    %c0_17 = arith.constant 0 : index
    %c0_18 = arith.constant 0 : index
    %40 = vector.load %arg2[%c0_17, %c0_18] : memref<4x1xi32, #tpu.memory_space<vmem>>, vector<4x1xi32>
    %41 = vector.broadcast %arg0 : i32 to vector<4x1xi32>
    %42 = arith.cmpi sgt, %40, %41 : vector<4x1xi32>
    %43 = arith.extui %42 : vector<4x1xi1> to vector<4x1xi32>
    %44 = arith.sitofp %43 : vector<4x1xi32> to vector<4x1xf32>
    %45 = vector.broadcast %44 : vector<4x1xf32> to vector<4x128xf32>
    %46 = arith.mulf %45, %37 : vector<4x128xf32>
    %cst_19 = arith.constant 1.000000e+00 : f32
    %47 = vector.broadcast %cst_19 : f32 to vector<4x1xf32>
    %48 = arith.subf %47, %44 : vector<4x1xf32>
    %c0_20 = arith.constant 0 : index
    %c0_21 = arith.constant 0 : index
    %49 = vector.load %arg10[%c0_20, %c0_21] : memref<4x128xf32, #tpu.memory_space<vmem>>, vector<4x128xf32>
    %50 = vector.broadcast %48 : vector<4x1xf32> to vector<4x128xf32>
    %51 = arith.mulf %50, %49 : vector<4x128xf32>
    %52 = arith.addf %46, %51 : vector<4x128xf32>
    %c0_22 = arith.constant 0 : index
    %c0_23 = arith.constant 0 : index
    %53 = vector.load %arg10[%c0_22, %c0_23] : memref<4x128xf32, #tpu.memory_space<vmem>>, vector<4x128xf32>
    tpu.vector_store %arg10[%c0_22, %c0_23], %52 {strides = array<i32>} : memref<4x128xf32, #tpu.memory_space<vmem>>, vector<4x128xf32>,
    %54 = vector.broadcast %44 : vector<4x1xf32> to vector<4x128xf32>
    %55 = arith.mulf %54, %39 : vector<4x128xf32>
    %cst_24 = arith.constant 1.000000e+00 : f32
    %56 = vector.broadcast %cst_24 : f32 to vector<4x1xf32>
    %57 = arith.subf %56, %44 : vector<4x1xf32>
    %c0_25 = arith.constant 0 : index
    %c0_26 = arith.constant 0 : index
    %58 = vector.load %arg9[%c0_25, %c0_26] : memref<4x128xf32, #tpu.memory_space<vmem>>, vector<4x128xf32>
    %59 = vector.broadcast %57 : vector<4x1xf32> to vector<4x128xf32>
    %60 = arith.mulf %59, %58 : vector<4x128xf32>
    %61 = arith.addf %55, %60 : vector<4x128xf32>
    %c0_27 = arith.constant 0 : index
    %c0_28 = arith.constant 0 : index
    %62 = vector.load %arg9[%c0_27, %c0_28] : memref<4x128xf32, #tpu.memory_space<vmem>>, vector<4x128xf32>
    tpu.vector_store %arg9[%c0_27, %c0_28], %61 {strides = array<i32>} : memref<4x128xf32, #tpu.memory_space<vmem>>, vector<4x128xf32>,
    %c7_i32 = arith.constant 7 : i32
    %63 = arith.cmpi eq, %arg0, %c7_i32 : i32
    %64 = arith.extui %63 : i1 to i32
    %c0_i32_29 = arith.constant 0 : i32
    %65 = arith.cmpi ne, %64, %c0_i32_29 : i32
    scf.if %65 {
      %c0_30 = arith.constant 0 : index
      %c0_31 = arith.constant 0 : index
      %66 = vector.load %arg9[%c0_30, %c0_31] : memref<4x128xf32, #tpu.memory_space<vmem>>, vector<4x128xf32>
      %c0_32 = arith.constant 0 : index
      %c0_33 = arith.constant 0 : index
      %67 = vector.load %arg6[%c0_32, %c0_33] : memref<128x128xf32, #tpu.memory_space<vmem>>, vector<128x128xf32>
      %cst_34 = arith.constant dense<0.000000e+00> : vector<4x128xf32>
      %68 = tpu.matmul %66, %67, %cst_34 {dimension_numbers = #tpu.dot_dimension_numbers<[1], [0], [0], [1], [0, 0, 1, 1], [], []>} : vector<4x128xf32>, vector<128x128xf32>, vector<4x128xf32> -> vector<4x128xf32>
      %c0_35 = arith.constant 0 : index
      %c0_36 = arith.constant 0 : index
      %69 = vector.load %arg7[%c0_35, %c0_36] : memref<1x128xf32, #tpu.memory_space<vmem>>, vector<1x128xf32>
      %70 = vector.broadcast %69 : vector<1x128xf32> to vector<4x128xf32>
      %71 = arith.addf %68, %70 : vector<4x128xf32>
      %72 = arith.mulf %71, %71 : vector<4x128xf32>
      %cst_37 = arith.constant dense<0.000000e+00> : vector<4xf32>
      %73 = vector.multi_reduction <add>, %72, %cst_37 [1] : vector<4x128xf32> to vector<4xf32>
      %74 = vector.shape_cast %73 : vector<4xf32> to vector<4x1xf32>
      %cst_38 = arith.constant 1.000000e-24 : f32
      %75 = vector.broadcast %cst_38 : f32 to vector<4x1xf32>
      %76 = arith.maximumf %74, %75 : vector<4x1xf32>
      %77 = math.rsqrt %76 : vector<4x1xf32>
      %78 = vector.broadcast %77 : vector<4x1xf32> to vector<4x128xf32>
      %79 = arith.mulf %71, %78 : vector<4x128xf32>
      %c0_39 = arith.constant 0 : index
      %c0_40 = arith.constant 0 : index
      %80 = vector.load %arg8[%c0_39, %c0_40] : memref<4x128xf32, #tpu.memory_space<vmem>>, vector<4x128xf32>
      tpu.vector_store %arg8[%c0_39, %c0_40], %79 {strides = array<i32>} : memref<4x128xf32, #tpu.memory_space<vmem>>, vector<4x128xf32>,
    } else {
    }
    return
  }
  func.func @transform_0(%arg0: i32) -> (i32, i32, i32) {
    %c0_i32 = arith.constant 0 : i32
    %c0_i32_0 = arith.constant 0 : i32
    %c0_i32_1 = arith.constant 0 : i32
    return %arg0, %c0_i32, %c0_i32_0 : i32, i32, i32
  }
  func.func @transform_1(%arg0: i32) -> (i32, i32) {
    %c0_i32 = arith.constant 0 : i32
    %c0_i32_0 = arith.constant 0 : i32
    %c0_i32_1 = arith.constant 0 : i32
    return %c0_i32, %c0_i32_0 : i32, i32
  }
  func.func @transform_2(%arg0: i32) -> (i32, i32) {
    %c0_i32 = arith.constant 0 : i32
    %c0_i32_0 = arith.constant 0 : i32
    %c0_i32_1 = arith.constant 0 : i32
    return %c0_i32, %c0_i32_0 : i32, i32
  }
  func.func @transform_3(%arg0: i32) -> (i32, i32) {
    %c0_i32 = arith.constant 0 : i32
    %c0_i32_0 = arith.constant 0 : i32
    %c0_i32_1 = arith.constant 0 : i32
    return %c0_i32, %c0_i32_0 : i32, i32
  }
  func.func @transform_4(%arg0: i32) -> (i32, i32) {
    %c0_i32 = arith.constant 0 : i32
    %c0_i32_0 = arith.constant 0 : i32
    %c0_i32_1 = arith.constant 0 : i32
    return %c0_i32, %c0_i32_0 : i32, i32
  }
  func.func @transform_5(%arg0: i32) -> (i32, i32) {
    %c0_i32 = arith.constant 0 : i32
    %c0_i32_0 = arith.constant 0 : i32
    %c0_i32_1 = arith.constant 0 : i32
    return %c0_i32, %c0_i32_0 : i32, i32
  }
  func.func @transform_6(%arg0: i32) -> (i32, i32) {
    %c0_i32 = arith.constant 0 : i32
    %c0_i32_0 = arith.constant 0 : i32
    %c0_i32_1 = arith.constant 0 : i32
    return %c0_i32, %c0_i32_0 : i32, i32
  }
  func.func @transform_7(%arg0: i32) -> (i32, i32) {
    %c0_i32 = arith.constant 0 : i32
    %c0_i32_0 = arith.constant 0 : i32
    %c0_i32_1 = arith.constant 0 : i32
    return %c0_i32, %c0_i32_0 : i32, i32
  }
}

</mosaic_0001>

<bundles_post_ra>
// kernel: tpu_custom_call.1
= control target key start
LH: loop header
LB: loop body
LE: loop exit
PB: predicated region body
PF: predicated region fallthrough
CT: control target
= control target key end

     0   :  { %12 = vsyncpa [#allocation5], 0  ;;  %s1842_s0 = inlined_call_operand.hbm [shape: f32[8,4,128], index: 0, kind: input, shape index: {}]   ;;  %s1843_s1 = inlined_call_operand.vmem [shape: s32[4,1], index: 1, kind: input, shape index: {}]   ;;  %s1844_s2 = inlined_call_operand.hbm [shape: f32[128,512], index: 2, kind: input, shape index: {}]   ;;  %s1845_s3 = inlined_call_operand.hbm [shape: f32[128,512], index: 3, kind: input, shape index: {}]   ;;  %s1846_s4 = inlined_call_operand.vmem [shape: f32[1,512], index: 4, kind: input, shape index: {}]   ;;  %s1847_s5 = inlined_call_operand.hbm [shape: f32[128,128], index: 5, kind: input, shape index: {}]   ;;  %s1848_s6 = inlined_call_operand.vmem [shape: f32[1,128], index: 6, kind: input, shape index: {}]   ;;  %s1849_s7 = inlined_call_operand.hbm [shape: f32[4,128], index: 7, kind: output, shape index: {}]  }
   0x1   :  { %14 = vsyncpa [#allocation5 + $0x1], 0 }
   0x2   :  { %15 = vsyncpa [#allocation8], 0 }
   0x3   :  { %16 = vsyncpa [#allocation11], 0 }
   0x4   :  { %17 = vsyncpa [#allocation6], 0  ;;  %s1596_s24 = smov 0   ;;  %s1598_s25 = smov 0  }
   0x5   :  { %s1600_s26 = smov 0   ;;  %s1602_s27 = smov 0  }
   0x6 LB: > { %s1615_s28 = sadd.s32 4294967295, %s1539_s27   ;;  %p43_p0 = scmp.ne.s32.totalorder %s1531_s25, %s1527_s24  ;;  %s1539_s27 = sphi %s1602_s27, %s1868_s27   ;;  %s1535_s26 = sphi %s1600_s26, %s1867_s26   ;;  %s1531_s25 = sphi %s1598_s25, %s1866_s25   ;;  %s1527_s24 = sphi %s1596_s24, %s1865_s24  }
   0x7   : > { %p1850_p1 = scmp.eq.s32.totalorder %s1615_s28, 0  ;;  %p1016_p2 = scmp.ge.s32.totalorder %s1539_s27, 1 }
   0x8   : > { %p201_p3 = scmp.lt.s32.totalorder %s1539_s27, 9  ;;  %s1541_s8 = smov [#allocation7]  }
   0x9   : > { %p1624_p5 = por %p1850_p1, %p43_p0  ;;  %s216_s9 = sshll.u32 %s1541_s8, 4  ;;  %s1632_s9 = int_to_ptr.vmem [resolvable:$true] %s216_s9 }
   0xa   : > { %p1628_p6 = pnand %p1016_p2, %p201_p3  ;;  %s1542_s11 = smov [#allocation9]  }
   0xb   : > { %s1853_s29 = scalar_select %p1624_p5, 1, 0 }
   0xc   : > { %s1854_s30 = scalar_select %p1628_p6, 1, 0 }
   0xd   : > { %p1265_p7 = pneg %p1628_p6  ;;  %s229_s12 = sshll.u32 %s1542_s11, 4  ;;  %s1642_s12 = int_to_ptr.vmem [resolvable:$true] %s229_s12 }
   0xe   : > { %s1543_s13 = smov [#allocation10]   ;;  %s1353_s17 = scalar_lea.hbm %s1844_s2, 8192 }
   0xf   : > { %p1638_p8 = pnand %p1265_p7, %p1850_p1  ;;  %s1644_s14 = sshll.u32 %s1543_s13, 4  ;;  %s246_s14 = int_to_ptr.vmem [resolvable:$true] %s1644_s14 }
  0x10   : > { %p1354_p9 = scmp.ne.s32.totalorder %s1844_s2, %s1353_s17  ;;  %p1360_p13 = scmp.lt.u32.totalorder %s1353_s17, %s1844_s2 }
  0x11   : > { %p1654_p10 = pneg %p1638_p8 }
  0x13   : > { %p1356_p11 = pnand %p1654_p10, %p1354_p9 }
  0x15   : > { %p1357_p12 = pneg %p1356_p11 }
  0x17   : > { %p1362_p0 = pnand %p1360_p13, %p1357_p12 }
  0x19   : > { %1365 = shalt.err (!%p1362_p0)
}
  0x1a   : > { %s1366_s23 = scalar_lea.vmem %s1632_s9, 8192  ;;  %p1374_p4 = scmp.lt.s32.totalorder %s1632_s9, %s1632_s9 }
  0x1b   : > { %p1367_p2 = scmp.ne.s32.totalorder %s1632_s9, %s1366_s23  ;;  %p1375_p1 = scmp.lt.s32.totalorder %s1366_s23, %s1366_s23 }
  0x1d   : > { %p1369_p3 = pnand %p1367_p2, %p1654_p10  ;;  %p1376_p9 = por %p1375_p1, %p1374_p4 }
  0x1f   : > { %p1370_p7 = pneg %p1369_p3 }
  0x21   : > { %p1377_p11 = pnand %p1376_p9, %p1370_p7 }
  0x23   : > { %1380 = shalt.err (!%p1377_p11)
}
  0x24   : > { %s1544_s24 = smov 512   ;;  %s1545_s8 = smov 32  }
  0x25   : > { %1268 = dma.hbm_to_vmem [thread:$0]  (!%p1638_p8), %s1844_s2, 8192, %s1632_s9, [#allocation8], %s1544_s24, %s1544_s24, %s1545_s8  }
  0x26   : > { %s1381_s17 = scalar_lea.hbm %s1845_s3, 8192 }
  0x27   : > { %p1382_p1 = scmp.ne.s32.totalorder %s1845_s3, %s1381_s17  ;;  %p1388_p13 = scmp.lt.u32.totalorder %s1381_s17, %s1845_s3 }
  0x29   : > { %p1384_p4 = pnand %p1382_p1, %p1654_p10 }
  0x2b   : > { %p1385_p12 = pneg %p1384_p4 }
  0x2d   : > { %p1390_p0 = pnand %p1388_p13, %p1385_p12 }
  0x2f   : > { %1393 = shalt.err (!%p1390_p0)
}
  0x30   : > { %s1394_s9 = scalar_lea.vmem %s1642_s12, 8192  ;;  %p1402_p9 = scmp.lt.s32.totalorder %s1642_s12, %s1642_s12 }
  0x31   : > { %p1395_p2 = scmp.ne.s32.totalorder %s1642_s12, %s1394_s9  ;;  %p1403_p11 = scmp.lt.s32.totalorder %s1394_s9, %s1394_s9 }
  0x33   : > { %p1397_p3 = pnand %p1395_p2, %p1654_p10  ;;  %p1404_p1 = por %p1403_p11, %p1402_p9 }
  0x35   : > { %p1398_p7 = pneg %p1397_p3 }
  0x37   : > { %p1405_p4 = pnand %p1404_p1, %p1398_p7 }
  0x39   : > { %1408 = shalt.err (!%p1405_p4)
}
  0x3a   : > { %1271 = dma.hbm_to_vmem [thread:$0]  (!%p1638_p8), %s1845_s3, 8192, %s1642_s12, [#allocation8], %s1544_s24, %s1544_s24, %s1545_s8  }
  0x3b   : > { %s1409_s16 = scalar_lea.hbm %s1847_s5, 2048 }
  0x3c   : > { %p1410_p12 = scmp.ne.s32.totalorder %s1847_s5, %s1409_s16  ;;  %p1416_p2 = scmp.lt.u32.totalorder %s1409_s16, %s1847_s5 }
  0x3e   : > { %p1412_p13 = pnand %p1410_p12, %p1654_p10 }
  0x40   : > { %p1413_p0 = pneg %p1412_p13 }
  0x42   : > { %p1418_p3 = pnand %p1416_p2, %p1413_p0 }
  0x44   : > { %1421 = shalt.err (!%p1418_p3)
}
  0x45   : > { %s1422_s22 = scalar_lea.vmem %s246_s14, 2048  ;;  %p1430_p1 = scmp.lt.s32.totalorder %s246_s14, %s246_s14 }
  0x46   : > { %p1423_p7 = scmp.ne.s32.totalorder %s246_s14, %s1422_s22  ;;  %p1431_p4 = scmp.lt.s32.totalorder %s1422_s22, %s1422_s22 }
  0x48   : > { %p1425_p9 = pnand %p1423_p7, %p1654_p10  ;;  %p1432_p5 = por %p1431_p4, %p1430_p1 }
  0x4a   : > { %p1426_p11 = pneg %p1425_p9 }
  0x4c   : > { %p1433_p6 = pnand %p1432_p5, %p1426_p11 }
  0x4e   : > { %1436 = shalt.err (!%p1433_p6)
}
  0x4f   : > { %s1546_s12 = smov 128   ;;  %s1547_s20 = smov 8  }
  0x50   : > { %1274 = dma.hbm_to_vmem [thread:$0]  (!%p1638_p8), %s1847_s5, 2048, %s246_s14, [#allocation11], %s1546_s12, %s1546_s12, %s1547_s20  }
  0x51   : > { %s1718_s9 = sadd.s32 1, %s1539_s27   ;;  %s30_s11 = sadd.s32 1, %s1535_s26 }
  0x52   : > { %s27_s23 = ssub.s32 %s1539_s27, %s1718_s9  ;;  %p37_p6 = scmp.ne.s32.totalorder %s1535_s26, %s1531_s25 }
  0x53   : > { %p28_p5 = scmp.eq.s32.totalorder %s27_s23, 0  ;;  %p38_p10 = scmp.eq.s32.totalorder %s1539_s27, 0 }
  0x54   : > { %p1282_p12 = scmp.lt.s32.totalorder %s1539_s27, 8  ;;  %s262_s15 = sand.u32 1, %s1535_s26  }
  0x55   : > { %s1728_s13 = scalar_select %p28_p5, %s1535_s26, %s30_s11  }
  0x56   : > { %p39_p13 = por %p38_p10, %p37_p6  ;;  %s1021_s16 = sshll.u32 %s262_s15, 2 }
  0x57   : > { %s1022_s17 = sshll.u32 %s1539_s27, 6  ;;  %s266_s14 = scalar_lea.vmem [#allocation4], %s1021_s16 }
  0x58   : > { %s1735_s19 = scalar_lea.hbm %s1842_s0, %s1022_s17  ;;  %s273_s21 = sshll.u32 %s266_s14, 4  ;;  %s1737_s21 = int_to_ptr.vmem [resolvable:$true] %s273_s21 }
  0x59   : > { %p1739_p8 = pnand %p1282_p12, %p39_p13  ;;  %s263_s27 = scalar_lea.sflag [#allocation5], %s262_s15 }
  0x5a   : > { %s1437_s12 = scalar_lea.hbm %s1735_s19, 64  ;;  %s1442_s8 = scalar_lea.hbm %s1842_s0, 512 }
  0x5b   : > { %p1438_p0 = scmp.ne.s32.totalorder %s1735_s19, %s1437_s12  ;;  %p1439_p2 = pneg %p1739_p8 }
  0x5c   : > { %p1443_p9 = scmp.lt.u32.totalorder %s1735_s19, %s1842_s0  ;;  %p1444_p11 = scmp.lt.u32.totalorder %s1442_s8, %s1437_s12 }
  0x5d   : > { %p1440_p3 = pnand %p1439_p2, %p1438_p0  ;;  %p1446_p4 = scmp.lt.u32.totalorder %s1437_s12, %s1735_s19 }
  0x5e   : > { %p1445_p1 = por %p1444_p11, %p1443_p9 }
  0x5f   : > { %p1441_p7 = pneg %p1440_p3 }
  0x60   : > { %p1447_p5 = por %p1446_p4, %p1445_p1 }
  0x62   : > { %p1448_p6 = pnand %p1447_p5, %p1441_p7 }
  0x64   : > { %1451 = shalt.err (!%p1448_p6)
}
  0x65   : > { %s1452_s15 = scalar_lea.vmem %s1737_s21, 64  ;;  %s1548_s16 = smov [#allocation4]  }
  0x66   : > { %p1453_p10 = scmp.ne.s32.totalorder %s1737_s21, %s1452_s15  ;;  %s1457_s17 = sshll.u32 %s1548_s16, 4  ;;  %s1458_s17 = int_to_ptr.vmem [resolvable:$false] %s1457_s17 }
  0x67   : > { %s1459_s10 = scalar_lea.vmem %s1458_s17, 128  ;;  %p1460_p0 = scmp.lt.s32.totalorder %s1737_s21, %s1458_s17 }
  0x68   : > { %p1455_p12 = pnand %p1453_p10, %p1439_p2  ;;  %p1461_p3 = scmp.lt.s32.totalorder %s1459_s10, %s1452_s15 }
  0x6a   : > { %p1456_p13 = pneg %p1455_p12  ;;  %p1462_p9 = por %p1461_p3, %p1460_p0 }
  0x6c   : > { %p1463_p11 = pnand %p1462_p9, %p1456_p13 }
  0x6e   : > { %1466 = shalt.err (!%p1463_p11)
}
  0x6f   : > { %1278 = dma.hbm_to_vmem [thread:$0]  (!%p1739_p8), %s1735_s19, 64, %s1737_s21, %s263_s27  }
  0x70   : > { %p1858_p7 = scmp.ne.s32.totalorder %s1854_s30, 0 }
  0x71   : > { %s284_s18 = sand.u32 (!%p1858_p7), 1, %s1531_s25   ;;  %p1859_p2 = scmp.ne.s32.totalorder (!%p1858_p7), %s1853_s29, 0 }
  0x72   : > { %282 = sbr.rel (%p1858_p7) target bundleno = 875 (0x36b), region = 48  ;;  %s1771_s14 = sshll.u32 (!%p1858_p7), %s284_s18, 2 }
  0x73   : > { %s285_s12 = scalar_lea.sflag (!%p1858_p7), [#allocation5], %s284_s18  ;;  %s288_s20 = scalar_lea.vmem (!%p1858_p7), [#allocation4], %s1771_s14 }
  0x79   : > { %1510 = dma.done.wait (%p1859_p2), %s285_s12, 64  }
  0x7a   : > { %1512 = vsyncadd (%p1859_p2), %s285_s12, 4294967232  ;;  %p1860_p1 = scmp.eq.s32.totalorder %s1615_s28, 0 }
  0x7c   : > { %1514 = dma.done.wait (%p1860_p1), [#allocation8], 16384   ;;  %p1861_p8 = pmov %p1860_p1 }
  0x7d   : > { %p1862_p4 = pmov %p1860_p1 }
  0x7e   : > { %1516 = vsyncadd (%p1861_p8), [#allocation8], 4294950912 }
  0x7f   : > { %1518 = dma.done.wait (%p1862_p4), [#allocation11], 2048   ;;  %p1863_p5 = pmov %p1860_p1 }
  0x80   : > { %p1864_p6 = scmp.ne.s32.totalorder %s1615_s28, 0 }
  0x81   : > { %1520 = vsyncadd (%p1863_p5), [#allocation11], 4294965248  ;;  %v1549_v0 = vmov (!%p1864_p6), 0.0  }
  0x82   : > { %329 = sbr.rel (%p1864_p6) target bundleno = 137 (0x89), region = 68  ;;  %330 = vst [vmem:[#allocation2] sm:$0xf] (!%p1864_p6), %v1549_v0  ;;  %331 = vst [vmem:[#allocation3] sm:$0xf] (!%p1864_p6), %v1549_v0 }
  0x89 PF: > { %v399_v1 = vld [vmem:[#allocation9 + $0x8] sm:$0xff]  ;;  %v401_v3 = vld [vmem:[#allocation9 + $0x18] sm:$0xff]  ;;  %v398_v6 = vld [vmem:[#allocation9] sm:$0xff]  ;;  %v1550_v8 = vmov 0.0   ;;  %v1551_v14 = vmov 0   ;;  %p1033_p10 = scmp.ne.s32.totalorder %s1615_s28, 7 }
  0x8a   : > { %v403_v2 = vld [vmem:[#allocation9 + $0x28] sm:$0xff]  ;;  %v405_v5 = vld [vmem:[#allocation9 + $0x38] sm:$0xff]  ;;  %v402_v7 = vld [vmem:[#allocation9 + $0x20] sm:$0xff]  ;;  %526 = vmatprep.mubr.f32.mxu0 %v1550_v8  ;;  %597 = vmatprep.mubr.f32.mxu1 %v1550_v8  ;;  %vm1553_vm1 = vmmov (!%p1033_p10), 0   ;;  %vm921_vm2 = vcmask (!%p1033_p10), 1043456  }
  0x8b   : > { %v1091_v4 = vpack.c.bf16 %v403_v2, %v399_v1  ;;  %v1123_v9 = vpack.c.bf16 %v405_v5, %v401_v3  ;;  %v1093_v10 = vpack.c.bf16 %v402_v7, %v398_v6  ;;  %v400_v11 = vld [vmem:[#allocation9 + $0x10] sm:$0xff]  ;;  %v407_v13 = vld [vmem:[#allocation9 + $0x48] sm:$0xff]  ;;  %1334 = vset.pattern.permute.xlu0 %v1551_v14  ;;  %v409_v17 = vld [vmem:[#allocation9 + $0x58] sm:$0xff] }
  0x8c   : > { %v404_v12 = vld [vmem:[#allocation9 + $0x30] sm:$0xff]  ;;  %v411_v16 = vld [vmem:[#allocation9 + $0x68] sm:$0xff]  ;;  %v413_v18 = vld [vmem:[#allocation9 + $0x78] sm:$0xff] }
  0x8d   : > { %1092 = vmatprep.subr.bf16.mxu0 %v1091_v4  ;;  %v1125_v15 = vpack.c.bf16 %v404_v12, %v400_v11  ;;  %1124 = vmatprep.subr.bf16.mxu1 %v1123_v9  ;;  %v1095_v19 = vpack.c.bf16 %v411_v16, %v407_v13  ;;  %v1127_v20 = vpack.c.bf16 %v413_v18, %v409_v17  ;;  %v406_v21 = vld [vmem:[#allocation9 + $0x40] sm:$0xff]  ;;  %v408_v23 = vld [vmem:[#allocation9 + $0x50] sm:$0xff]  ;;  %v415_v26 = vld [vmem:[#allocation9 + $0x88] sm:$0xff] }
  0x8e   : > { %1094 = vmatpush1.bf16.msra.mxu0 %v1093_v10  ;;  %v410_v22 = vld [vmem:[#allocation9 + $0x60] sm:$0xff]  ;;  %v412_v25 = vld [vmem:[#allocation9 + $0x70] sm:$0xff]  ;;  %v419_v27 = vld [vmem:[#allocation9 + $0xa8] sm:$0xff] }
  0x8f   : > { %1126 = vmatpush1.bf16.msra.mxu1 %v1125_v15  ;;  %v1097_v24 = vpack.c.bf16 %v410_v22, %v406_v21  ;;  %1096 = vmatprep.subr.bf16.mxu0 %v1095_v19  ;;  %v1129_v28 = vpack.c.bf16 %v412_v25, %v408_v23  ;;  %v1099_v29 = vpack.c.bf16 %v419_v27, %v415_v26  ;;  %v417_v30 = vld [vmem:[#allocation9 + $0x98] sm:$0xff]  ;;  %v414_v32 = vld [vmem:[#allocation9 + $0x80] sm:$0xff]  ;;  %v416_v35 = vld [vmem:[#allocation9 + $0x90] sm:$0xff] }
  0x90   : > { %1128 = vmatprep.subr.bf16.mxu1 %v1127_v20  ;;  %v421_v31 = vld [vmem:[#allocation9 + $0xb8] sm:$0xff]  ;;  %v418_v34 = vld [vmem:[#allocation9 + $0xa0] sm:$0xff]  ;;  %v420_v36 = vld [vmem:[#allocation9 + $0xb0] sm:$0xff] }
  0x91   : > { %v1131_v33 = vpack.c.bf16 %v421_v31, %v417_v30  ;;  %v1101_v37 = vpack.c.bf16 %v418_v34, %v414_v32  ;;  %v423_v38 = vld [vmem:[#allocation9 + $0xc8] sm:$0xff]  ;;  %v425_v40 = vld [vmem:[#allocation9 + $0xd8] sm:$0xff]  ;;  %v1133_v41 = vpack.c.bf16 %v420_v36, %v416_v35  ;;  %v422_v44 = vld [vmem:[#allocation9 + $0xc0] sm:$0xff] }
  0x92   : > { %1098 = vmatpush1.bf16.msra.mxu0 %v1097_v24  ;;  %v427_v39 = vld [vmem:[#allocation9 + $0xe8] sm:$0xff]  ;;  %v429_v43 = vld [vmem:[#allocation9 + $0xf8] sm:$0xff]  ;;  %v426_v45 = vld [vmem:[#allocation9 + $0xe0] sm:$0xff] }
  0x93   : > { %1130 = vmatpush1.bf16.msra.mxu1 %v1129_v28  ;;  %1100 = vmatprep.subr.bf16.mxu0 %v1099_v29  ;;  %v1103_v42 = vpack.c.bf16 %v427_v39, %v423_v38  ;;  %v1135_v46 = vpack.c.bf16 %v429_v43, %v425_v40  ;;  %v424_v47 = vld [vmem:[#allocation9 + $0xd0] sm:$0xff]  ;;  %v431_v49 = vld [vmem:[#allocation9 + $0x108] sm:$0xff]  ;;  %v433_v51 = vld [vmem:[#allocation9 + $0x118] sm:$0xff]  ;;  %v1105_v53 = vpack.c.bf16 %v426_v45, %v422_v44 }
  0x94   : > { %1132 = vmatprep.subr.bf16.mxu1 %v1131_v33  ;;  %v428_v48 = vld [vmem:[#allocation9 + $0xf0] sm:$0xff]  ;;  %v435_v50 = vld [vmem:[#allocation9 + $0x128] sm:$0xff]  ;;  %v437_v52 = vld [vmem:[#allocation9 + $0x138] sm:$0xff] }
  0x95   : > { %v1137_v54 = vpack.c.bf16 %v428_v48, %v424_v47  ;;  %v1107_v55 = vpack.c.bf16 %v435_v50, %v431_v49  ;;  %v430_v56 = vld [vmem:[#allocation9 + $0x100] sm:$0xff]  ;;  %v432_v58 = vld [vmem:[#allocation9 + $0x110] sm:$0xff]  ;;  %v1139_v59 = vpack.c.bf16 %v437_v52, %v433_v51  ;;  %v439_v61 = vld [vmem:[#allocation9 + $0x148] sm:$0xff] }
  0x96   : > { %1102 = vmatpush1.bf16.msra.mxu0 %v1101_v37  ;;  %v434_v57 = vld [vmem:[#allocation9 + $0x120] sm:$0xff]  ;;  %v436_v60 = vld [vmem:[#allocation9 + $0x130] sm:$0xff]  ;;  %v443_v62 = vld [vmem:[#allocation9 + $0x168] sm:$0xff] }
  0x97   : > { %1134 = vmatpush1.bf16.msra.mxu1 %v1133_v41  ;;  %1104 = vmatprep.subr.bf16.mxu0 %v1103_v42  ;;  %v441_v63 = vld [vmem:[#allocation9 + $0x158] sm:$0xff]  ;;  %v1109_v1 = vpack.c.bf16 %v434_v57, %v430_v56  ;;  %v1141_v2 = vpack.c.bf16 %v436_v60, %v432_v58  ;;  %v1111_v3 = vpack.c.bf16 %v443_v62, %v439_v61  ;;  %v438_v4 = vld [vmem:[#allocation9 + $0x140] sm:$0xff]  ;;  %v440_v6 = vld [vmem:[#allocation9 + $0x150] sm:$0xff] }
  0x98   : > { %1136 = vmatprep.subr.bf16.mxu1 %v1135_v46  ;;  %v445_v0 = vld [vmem:[#allocation9 + $0x178] sm:$0xff]  ;;  %v442_v5 = vld [vmem:[#allocation9 + $0x160] sm:$0xff]  ;;  %v444_v9 = vld [vmem:[#allocation9 + $0x170] sm:$0xff] }
  0x99   : > { %v1143_v7 = vpack.c.bf16 %v445_v0, %v441_v63  ;;  %v447_v10 = vld [vmem:[#allocation9 + $0x188] sm:$0xff]  ;;  %v449_v12 = vld [vmem:[#allocation9 + $0x198] sm:$0xff]  ;;  %v1113_v14 = vpack.c.bf16 %v442_v5, %v438_v4  ;;  %v1145_v15 = vpack.c.bf16 %v444_v9, %v440_v6  ;;  %v446_v17 = vld [vmem:[#allocation9 + $0x180] sm:$0xff] }
  0x9a   : > { %1106 = vmatpush1.bf16.msra.mxu0 %v1105_v53  ;;  %v451_v11 = vld [vmem:[#allocation9 + $0x1a8] sm:$0xff]  ;;  %v453_v13 = vld [vmem:[#allocation9 + $0x1b8] sm:$0xff]  ;;  %v450_v18 = vld [vmem:[#allocation9 + $0x1a0] sm:$0xff] }
  0x9b   : > { %1138 = vmatpush1.bf16.msra.mxu1 %v1137_v54  ;;  %1108 = vmatprep.subr.bf16.mxu0 %v1107_v55  ;;  %v1115_v16 = vpack.c.bf16 %v451_v11, %v447_v10  ;;  %v448_v19 = vld [vmem:[#allocation9 + $0x190] sm:$0xff]  ;;  %v1147_v20 = vpack.c.bf16 %v453_v13, %v449_v12  ;;  %v455_v22 = vld [vmem:[#allocation9 + $0x1c8] sm:$0xff]  ;;  %v457_v24 = vld [vmem:[#allocation9 + $0x1d8] sm:$0xff]  ;;  %v1117_v26 = vpack.c.bf16 %v450_v18, %v446_v17  ;;  %v798_v18 = vstv %s1615_s28 }
  0x9c   : > { %1140 = vmatprep.subr.bf16.mxu1 %v1139_v59  ;;  %v452_v21 = vld [vmem:[#allocation9 + $0x1b0] sm:$0xff]  ;;  %v459_v23 = vld [vmem:[#allocation9 + $0x1e8] sm:$0xff]  ;;  %v461_v25 = vld [vmem:[#allocation9 + $0x1f8] sm:$0xff] }
  0x9d   : > { %v1149_v27 = vpack.c.bf16 %v452_v21, %v448_v19  ;;  %v1119_v28 = vpack.c.bf16 %v459_v23, %v455_v22  ;;  %v454_v29 = vld [vmem:[#allocation9 + $0x1c0] sm:$0xff]  ;;  %v456_v31 = vld [vmem:[#allocation9 + $0x1d0] sm:$0xff]  ;;  %v1151_v32 = vpack.c.bf16 %v461_v25, %v457_v24  ;;  %v334_v34 = vld [vmem:[#allocation7 + $0x8] sm:$0xff] }
  0x9e   : > { %1110 = vmatpush1.bf16.msra.mxu0 %v1109_v1  ;;  %v458_v30 = vld [vmem:[#allocation9 + $0x1e0] sm:$0xff]  ;;  %v460_v33 = vld [vmem:[#allocation9 + $0x1f0] sm:$0xff]  ;;  %v338_v35 = vld [vmem:[#allocation7 + $0x28] sm:$0xff] }
  0x9f   : > { %1142 = vmatpush1.bf16.msra.mxu1 %v1141_v2  ;;  %1112 = vmatprep.subr.bf16.mxu0 %v1111_v3  ;;  %v336_v36 = vld [vmem:[#allocation7 + $0x18] sm:$0xff]  ;;  %v1121_v38 = vpack.c.bf16 %v458_v30, %v454_v29  ;;  %v1153_v39 = vpack.c.bf16 %v460_v33, %v456_v31  ;;  %v1155_v40 = vpack.c.bf16 %v338_v35, %v334_v34  ;;  %v333_v41 = vld [vmem:[#allocation7] sm:$0xff]  ;;  %v335_v43 = vld [vmem:[#allocation7 + $0x10] sm:$0xff] }
  0xa0   : > { %1144 = vmatprep.subr.bf16.mxu1 %v1143_v7  ;;  %v340_v37 = vld [vmem:[#allocation7 + $0x38] sm:$0xff]  ;;  %v337_v42 = vld [vmem:[#allocation7 + $0x20] sm:$0xff]  ;;  %v339_v45 = vld [vmem:[#allocation7 + $0x30] sm:$0xff] }
  0xa1   : > { %v1187_v44 = vpack.c.bf16 %v340_v37, %v336_v36  ;;  %v342_v46 = vld [vmem:[#allocation7 + $0x48] sm:$0xff]  ;;  %v344_v48 = vld [vmem:[#allocation7 + $0x58] sm:$0xff]  ;;  %v397_v50 = vld [vmem:[#allocation2] sm:$0xf]  ;;  %v1157_v51 = vpack.c.bf16 %v337_v42, %v333_v41  ;;  %v1189_v52 = vpack.c.bf16 %v339_v45, %v335_v43 }
  0xa2   : > { %1114 = vmatpush1.bf16.msra.mxu0 %v1113_v14  ;;  %v346_v47 = vld [vmem:[#allocation7 + $0x68] sm:$0xff]  ;;  %v348_v49 = vld [vmem:[#allocation7 + $0x78] sm:$0xff]  ;;  %v341_v54 = vld [vmem:[#allocation7 + $0x40] sm:$0xff] }
  0xa3   : > { %1146 = vmatpush1.bf16.msra.mxu1 %v1145_v15  ;;  %1116 = vmatprep.subr.bf16.mxu0 %v1115_v16  ;;  %v1159_v53 = vpack.c.bf16 %v346_v47, %v342_v46  ;;  %v345_v55 = vld [vmem:[#allocation7 + $0x60] sm:$0xff]  ;;  %v343_v56 = vld [vmem:[#allocation7 + $0x50] sm:$0xff]  ;;  %v1191_v57 = vpack.c.bf16 %v348_v49, %v344_v48  ;;  %v350_v59 = vld [vmem:[#allocation7 + $0x88] sm:$0xff] }
  0xa4   : > { %1148 = vmatprep.subr.bf16.mxu1 %v1147_v20  ;;  %v347_v58 = vld [vmem:[#allocation7 + $0x70] sm:$0xff]  ;;  %v354_v60 = vld [vmem:[#allocation7 + $0xa8] sm:$0xff]  ;;  %v352_v61 = vld [vmem:[#allocation7 + $0x98] sm:$0xff]  ;;  %v1161_v63 = vpack.c.bf16 %v345_v55, %v341_v54 }
  0xa5   : > { %v356_v62 = vld [vmem:[#allocation7 + $0xb8] sm:$0xff]  ;;  %v1193_v0 = vpack.c.bf16 %v347_v58, %v343_v56  ;;  %v1163_v1 = vpack.c.bf16 %v354_v60, %v350_v59  ;;  %v349_v2 = vld [vmem:[#allocation7 + $0x80] sm:$0xff]  ;;  %v351_v4 = vld [vmem:[#allocation7 + $0x90] sm:$0xff] }
  0xa6   : > { %1118 = vmatpush1.bf16.msra.mxu0 %v1117_v26  ;;  %v353_v3 = vld [vmem:[#allocation7 + $0xa0] sm:$0xff]  ;;  %v1195_v5 = vpack.c.bf16 %v356_v62, %v352_v61  ;;  %v355_v6 = vld [vmem:[#allocation7 + $0xb0] sm:$0xff]  ;;  %v358_v7 = vld [vmem:[#allocation7 + $0xc8] sm:$0xff] }
  0xa7   : > { %1150 = vmatpush1.bf16.msra.mxu1 %v1149_v27  ;;  %1120 = vmatprep.subr.bf16.mxu0 %v1119_v28  ;;  %v362_v9 = vld [vmem:[#allocation7 + $0xe8] sm:$0xff]  ;;  %v360_v10 = vld [vmem:[#allocation7 + $0xd8] sm:$0xff]  ;;  %v1165_v12 = vpack.c.bf16 %v353_v3, %v349_v2  ;;  %v1197_v13 = vpack.c.bf16 %v355_v6, %v351_v4  ;;  %v357_v15 = vld [vmem:[#allocation7 + $0xc0] sm:$0xff] }
  0xa8   : > { %1152 = vmatprep.subr.bf16.mxu1 %v1151_v32  ;;  %v364_v11 = vld [vmem:[#allocation7 + $0xf8] sm:$0xff]  ;;  %v1167_v14 = vpack.c.bf16 %v362_v9, %v358_v7  ;;  %v361_v16 = vld [vmem:[#allocation7 + $0xe0] sm:$0xff]  ;;  %v359_v17 = vld [vmem:[#allocation7 + $0xd0] sm:$0xff] }
  0xa9   : > { %v1199_v19 = vpack.c.bf16 %v364_v11, %v360_v10  ;;  %v363_v20 = vld [vmem:[#allocation7 + $0xf0] sm:$0xff]  ;;  %v366_v21 = vld [vmem:[#allocation7 + $0x108] sm:$0xff]  ;;  %v368_v23 = vld [vmem:[#allocation7 + $0x118] sm:$0xff]  ;;  %v1169_v26 = vpack.c.bf16 %v361_v16, %v357_v15  ;;  %v748_v11 = vlaneseq }
  0xaa   : > { %1122 = vmatpush1.bf16.msra.mxu0 %v1121_v38  ;;  %v370_v22 = vld [vmem:[#allocation7 + $0x128] sm:$0xff]  ;;  %v372_v24 = vld [vmem:[#allocation7 + $0x138] sm:$0xff]  ;;  %v797_v25 = vld [vmem:[%s1843_s1] sm:$0xf]  ;;  %v1201_v27 = vpack.c.bf16 %v363_v20, %v359_v17 }
  0xab   : > { %1154 = vmatpush1.bf16.msra.mxu1 %v1153_v39  ;;  %1156 = vmatprep.subr.bf16.mxu0 %v1155_v40  ;;  %vm799_vm0 = vcmp.gt.s32.totalorder %v797_v25, %v798_v18  ;;  %v1171_v28 = vpack.c.bf16 %v370_v22, %v366_v21  ;;  %v365_v29 = vld [vmem:[#allocation7 + $0x100] sm:$0xff]  ;;  %v367_v31 = vld [vmem:[#allocation7 + $0x110] sm:$0xff]  ;;  %v1203_v33 = vpack.c.bf16 %v372_v24, %v368_v23  ;;  %v374_v35 = vld [vmem:[#allocation7 + $0x148] sm:$0xff] }
  0xac   : > { %1188 = vmatprep.subr.bf16.mxu1 %v1187_v44  ;;  %v369_v30 = vld [vmem:[#allocation7 + $0x120] sm:$0xff]  ;;  %v1032_v32 = vsel %vm799_vm0, 1.0, %v1550_v8  ;;  %v371_v34 = vld [vmem:[#allocation7 + $0x130] sm:$0xff]  ;;  %v378_v36 = vld [vmem:[#allocation7 + $0x168] sm:$0xff] }
  0xad   : > { %527 = vmatmul.mubr.f32.vlgmr.msra.gmra.mrb[0].mxu0 %v397_v50  ;;  %804 = vperm.xlu0 %1334, %v1032_v32   ;;  %v808_v37 = vsub.f32 1.0, %v1032_v32  ;;  %v376_v38 = vld [vmem:[#allocation7 + $0x158] sm:$0xff]  ;;  %v1173_v40 = vpack.c.bf16 %v369_v30, %v365_v29  ;;  %v1205_v41 = vpack.c.bf16 %v371_v34, %v367_v31  ;;  %v1175_v42 = vpack.c.bf16 %v378_v36, %v374_v35  ;;  %v373_v43 = vld [vmem:[#allocation7 + $0x140] sm:$0xff]  ;;  %v375_v45 = vld [vmem:[#allocation7 + $0x150] sm:$0xff] }
  0xae   : > { %598 = vmatmul.mubr.f32.vlgmr.msra.gmra.mrb[0].mxu1 %v397_v50  ;;  %1158 = vmatpush1.bf16.msra.mxu0 %v1157_v51  ;;  %v380_v39 = vld [vmem:[#allocation7 + $0x178] sm:$0xff]  ;;  %v377_v44 = vld [vmem:[#allocation7 + $0x160] sm:$0xff]  ;;  %v379_v46 = vld [vmem:[#allocation7 + $0x170] sm:$0xff] }
  0xaf   : > { %1190 = vmatpush1.bf16.msra.mxu1 %v1189_v52  ;;  %1160 = vmatprep.subr.bf16.mxu0 %v1159_v53  ;;  %v382_v47 = vld [vmem:[#allocation7 + $0x188] sm:$0xff]  ;;  %v384_v49 = vld [vmem:[#allocation7 + $0x198] sm:$0xff]  ;;  %v1177_v51 = vpack.c.bf16 %v377_v44, %v373_v43  ;;  %v1209_v52 = vpack.c.bf16 %v379_v46, %v375_v45  ;;  %v381_v54 = vld [vmem:[#allocation7 + $0x180] sm:$0xff] }
  0xb0   : > { %1192 = vmatprep.subr.bf16.mxu1 %v1191_v57  ;;  %668 = vmatprep.mubr.f32.mxu0 %v1550_v8  ;;  %v386_v48 = vld [vmem:[#allocation7 + $0x1a8] sm:$0xff]  ;;  %v388_v50 = vld [vmem:[#allocation7 + $0x1b8] sm:$0xff]  ;;  %v385_v55 = vld [vmem:[#allocation7 + $0x1a0] sm:$0xff] }
  0xb1   : > { %739 = vmatprep.mubr.f32.mxu1 %v1550_v8  ;;  %v1207_v8 = vpack.c.bf16 %v380_v39, %v376_v38  ;;  %811 = vperm.xlu0 %1334, %v808_v37   ;;  %v1179_v53 = vpack.c.bf16 %v386_v48, %v382_v47  ;;  %v383_v56 = vld [vmem:[#allocation7 + $0x190] sm:$0xff]  ;;  %v1211_v57 = vpack.c.bf16 %v388_v50, %v384_v49  ;;  %v390_v59 = vld [vmem:[#allocation7 + $0x1c8] sm:$0xff]  ;;  %v392_v61 = vld [vmem:[#allocation7 + $0x1d8] sm:$0xff] }
  0xb2   : > { %1162 = vmatpush1.bf16.msra.mxu0 %v1161_v63  ;;  %v387_v58 = vld [vmem:[#allocation7 + $0x1b0] sm:$0xff]  ;;  %v394_v60 = vld [vmem:[#allocation7 + $0x1e8] sm:$0xff]  ;;  %v396_v62 = vld [vmem:[#allocation7 + $0x1f8] sm:$0xff]  ;;  %v1181_v63 = vpack.c.bf16 %v385_v55, %v381_v54 }
  0xb3   : > { %1194 = vmatpush1.bf16.msra.mxu1 %v1193_v0  ;;  %1164 = vmatprep.subr.bf16.mxu0 %v1163_v1  ;;  %v1213_v0 = vpack.c.bf16 %v387_v58, %v383_v56  ;;  %v1183_v1 = vpack.c.bf16 %v394_v60, %v390_v59  ;;  %v389_v2 = vld [vmem:[#allocation7 + $0x1c0] sm:$0xff]  ;;  %v1215_v4 = vpack.c.bf16 %v396_v62, %v392_v61  ;;  %v395_v6 = vld [vmem:[#allocation7 + $0x1f0] sm:$0xff]  ;;  %v332_v10 = vld [vmem:[%s288_s20] sm:$0xf]  ;;  %v1552_v60 = vmov (!%p1033_p10), 0.0|0.0  }
  0xb4   : > { %1196 = vmatprep.subr.bf16.mxu1 %v1195_v5  ;;  %v393_v3 = vld [vmem:[#allocation7 + $0x1e0] sm:$0xff]  ;;  %v391_v5 = vld [vmem:[#allocation7 + $0x1d0] sm:$0xff]  ;;  %v828_v58 = vld [vmem:[#allocation10 + $0x8] sm:$0xff] (!%p1033_p10) }
  0xb5   : > { %v1185_v7 = vpack.c.bf16 %v393_v3, %v389_v2  ;;  %v1217_v9 = vpack.c.bf16 %v395_v6, %v391_v5  ;;  %v829_v59 = vld [vmem:[#allocation10 + $0x10] sm:$0xff] (!%p1033_p10)  ;;  %v830_v62 = vld [vmem:[#allocation10 + $0x18] sm:$0xff] (!%p1033_p10)  ;;  %v832_v2 = vld [vmem:[#allocation10 + $0x28] sm:$0xff] (!%p1033_p10) }
  0xb6   : > { %1166 = vmatpush1.bf16.msra.mxu0 %v1165_v12  ;;  %v749_v12 = vshrl.u32 %v748_v11, 7  ;;  %v834_v5 = vld [vmem:[#allocation10 + $0x38] sm:$0xff] (!%p1033_p10)  ;;  %v837_v11 = vld [vmem:[#allocation10 + $0x50] sm:$0xff] (!%p1033_p10) }
  0xb7   : > { %1198 = vmatpush1.bf16.msra.mxu1 %v1197_v13  ;;  %1168 = vmatprep.subr.bf16.mxu0 %v1167_v14  ;;  %v746_v14 = vld [vmem:[%s1846_s4] sm:$0xf] }
  0xb8   : > { %1200 = vmatprep.subr.bf16.mxu1 %v1199_v19  ;;  %v750_v13 = vsub.s32 0, %v749_v12  ;;  %v754_v15 = vsub.s32 1, %v749_v12  ;;  %v762_v19 = vsub.s32 3, %v749_v12 }
  0xba   : > { %1170 = vmatpush1.bf16.msra.mxu0 %v1169_v26  ;;  %v751_v16 = vrot.slane %v746_v14, %v750_v13  ;;  %v755_v17 = vrot.slane %v746_v14, %v754_v15  ;;  %v840_v15 = vld [vmem:[#allocation10 + $0x68] sm:$0xff] (!%p1033_p10) }
  0xbb   : > { %1202 = vmatpush1.bf16.msra.mxu1 %v1201_v27  ;;  %1172 = vmatprep.subr.bf16.mxu0 %v1171_v28  ;;  %v763_v27 = vrot.slane %v746_v14, %v762_v19  ;;  %v758_v28 = vsub.s32 2, %v749_v12  ;;  %v838_v12 = vld [vmem:[#allocation10 + $0x58] sm:$0xff] (!%p1033_p10) }
  0xbc   : > { %1204 = vmatprep.subr.bf16.mxu1 %v1203_v33  ;;  %v1235_v13 = vpack.c.bf16 (!%p1033_p10), %v838_v12, %v837_v11 }
  0xbd   : > { %v759_v30 = vrot.slane %v746_v14, %v758_v28  ;;  %v839_v14 = vld [vmem:[#allocation10 + $0x60] sm:$0xff] (!%p1033_p10) }
  0xbe   : > { %1174 = vmatpush1.bf16.msra.mxu0 %v1173_v40  ;;  %v791_v40 = vld [vmem:[#allocation3] sm:$0xf] }
  0xbf   : > { %1206 = vmatpush1.bf16.msra.mxu1 %v1205_v41  ;;  %1176 = vmatprep.subr.bf16.mxu0 %v1175_v42 }
  0xc0   : > { %1208 = vmatprep.subr.bf16.mxu1 %v1207_v8 }
  0xc2   : > { %1178 = vmatpush1.bf16.msra.mxu0 %v1177_v51 }
  0xc3   : > { %1210 = vmatpush1.bf16.msra.mxu1 %v1209_v52  ;;  %1180 = vmatprep.subr.bf16.mxu0 %v1179_v53  ;;  %v818_v52 = vld [vmem:[#allocation2] sm:$0xf] }
  0xc4   : > { %1212 = vmatprep.subr.bf16.mxu1 %v1211_v57  ;;  %v827_v57 = vld [vmem:[#allocation10] sm:$0xff] (!%p1033_p10) }
  0xc5   : > { %v1220_v61 = vpack.c.bf16 (!%p1033_p10), %v828_v58, %v827_v57 }
  0xc6   : > { %1182 = vmatpush1.bf16.msra.mxu0 %v1181_v63  ;;  %v1554_v63 = vmov (!%p1033_p10), 0.0  }
  0xc7   : > { %1214 = vmatpush1.bf16.msra.mxu1 %v1213_v0  ;;  %1184 = vmatprep.subr.bf16.mxu0 %v1183_v1  ;;  %v1223_v0 = vpack.c.bf16 (!%p1033_p10), %v830_v62, %v829_v59  ;;  %v831_v1 = vld [vmem:[#allocation10 + $0x20] sm:$0xff] (!%p1033_p10) }
  0xc8   : > { %1216 = vmatprep.subr.bf16.mxu1 %v1215_v4  ;;  %v1226_v3 = vpack.c.bf16 (!%p1033_p10), %v832_v2, %v831_v1  ;;  %v833_v4 = vld [vmem:[#allocation10 + $0x30] sm:$0xff] (!%p1033_p10) }
  0xc9   : > { %v1229_v6 = vpack.c.bf16 (!%p1033_p10), %v834_v5, %v833_v4 }
  0xca   : > { %1186 = vmatpush1.bf16.msra.mxu0 %v1185_v7  ;;  %v835_v7 = vld [vmem:[#allocation10 + $0x40] sm:$0xff] (!%p1033_p10) }
  0xcb   : > { %1218 = vmatpush1.bf16.msra.mxu1 %v1217_v9  ;;  %1219 = vmatprep.subr.bf16.mxu0 (!%p1033_p10), %v1552_v60  ;;  %v836_v9 = vld [vmem:[#allocation10 + $0x48] sm:$0xff] (!%p1033_p10) }
  0xcd   : > { %669 = vmatmul.mubr.f32.vlgmr.msra.gmra.mrb[0].mxu0 %v332_v10 }
  0xce   : > { %740 = vmatmul.mubr.f32.vlgmr.msra.gmra.mrb[0].mxu1 %v332_v10  ;;  %1088 = vmatprep.mubr.msk.f32.mxu0 (!%p1033_p10), %vm1553_vm1, %v1554_v63  ;;  %v1232_v10 = vpack.c.bf16 (!%p1033_p10), %v836_v9, %v835_v7 }
  0xcf   : > { %1221 = vmatpush3.bf16.msra.mxu0 (!%p1033_p10), %v1220_v61 }
  0xd0   : > { %1222 = vmatprep.subr.bf16.mxu0 (!%p1033_p10), %v1552_v60 }
  0xd3   : > { %1224 = vmatpush3.bf16.msra.mxu0 (!%p1033_p10), %v1223_v0 }
  0xd4   : > { %1225 = vmatprep.subr.bf16.mxu0 (!%p1033_p10), %v1552_v60 }
  0xd7   : > { %1227 = vmatpush3.bf16.msra.mxu0 (!%p1033_p10), %v1226_v3 }
  0xd8   : > { %1228 = vmatprep.subr.bf16.mxu0 (!%p1033_p10), %v1552_v60 }
  0xdb   : > { %1230 = vmatpush3.bf16.msra.mxu0 (!%p1033_p10), %v1229_v6 }
  0xdc   : > { %1231 = vmatprep.subr.bf16.mxu0 (!%p1033_p10), %v1552_v60 }
  0xdf   : > { %1233 = vmatpush3.bf16.msra.mxu0 (!%p1033_p10), %v1232_v10 }
  0xe0   : > { %1234 = vmatprep.subr.bf16.mxu0 (!%p1033_p10), %v1552_v60 }
  0xe3   : > { %1236 = vmatpush3.bf16.msra.mxu0 (!%p1033_p10), %v1235_v13 }
  0xe4   : > { %1237 = vmatprep.subr.bf16.mxu0 (!%p1033_p10), %v1552_v60 }
 0x12c   : > { %v805_v37 = vpop.permute.xlu0 %804 }
 0x130   : > { %v812_v45 = vpop.permute.xlu0 %811 }
 0x131   : > { %v814_v47 = vmul.f32 %v812_v45, %v791_v40  ;;  %v819_v55 = vmul.f32 %v818_v52, %v812_v45 }
 0x1a0   : > { %v670_v18 = vpop.f32.mrb[0].mxu0 }
 0x1a1   : > { %v768_v20 = vadd.f32 %v751_v16, %v670_v18  ;;  %v741_v21 = vpop.f32.mrb[0].mxu1  ;;  %v672_v22 = vpop.f32.mrb[1].mxu0  ;;  %v1238_v16 = vpack.c.bf16 (!%p1033_p10), %v840_v15, %v839_v14  ;;  %v842_v18 = vld [vmem:[#allocation10 + $0x78] sm:$0xff] (!%p1033_p10) }
 0x1a2   : > { %v769_v23 = vadd.f32 %v755_v17, %v672_v22  ;;  %v743_v24 = vpop.f32.mrb[1].mxu1  ;;  %v770_v32 = vadd.f32 %v759_v30, %v741_v21  ;;  %v841_v17 = vld [vmem:[#allocation10 + $0x70] sm:$0xff] (!%p1033_p10) }
 0x1a3   : > { %v1029_v25 = vmul.f32 -1.442695, %v768_v20  ;;  %v771_v29 = vadd.f32 %v763_v27, %v743_v24  ;;  %1239 = vmatpush3.bf16.msra.mxu0 (!%p1033_p10), %v1238_v16  ;;  %v1241_v19 = vpack.c.bf16 (!%p1033_p10), %v842_v18, %v841_v17  ;;  %v1034_v21 = vld [vmem:[%s1848_s6] ss:$0 sm:$0xff] (!%p1033_p10) }
 0x1a4   : > { %v1030_v26 = vmul.f32 -1.442695, %v769_v23  ;;  %1240 = vmatprep.subr.bf16.mxu0 (!%p1033_p10), %v1552_v60 }
 0x1a5   : > { %1335 = vpow2.f32 %v1029_v25  ;;  %v1031_v31 = vmul.f32 -1.442695, %v771_v29 }
 0x1a6   : > { %1337 = vpow2.f32 %v1030_v26 }
 0x1a7   : > { %1339 = vpow2.f32 %v1031_v31  ;;  %1242 = vmatpush3.bf16.msra.mxu0 (!%p1033_p10), %v1241_v19 }
 0x1a8   : > { %1341 = vtanh.f32 %v770_v32 }
 0x1af   : > { %v1336_v33 = vpop.eup %1335 }
 0x1b0   : > { %v1338_v34 = vpop.eup %1337  ;;  %v775_v35 = vadd.f32 1.0, %v1336_v33 }
 0x1b1   : > { %v781_v36 = vadd.f32 1.0, %v1338_v34  ;;  %v1340_v38 = vpop.eup %1339 }
 0x1b2   : > { %1343 = vrcp.f32 %v775_v35  ;;  %v1342_v39 = vpop.eup %1341  ;;  %v788_v43 = vadd.f32 1.0, %v1340_v38 }
 0x1b3   : > { %1345 = vrcp.f32 %v781_v36 }
 0x1b4   : > { %1347 = vrcp.f32 %v788_v43 }
 0x1bc   : > { %v1344_v41 = vpop.eup %1343 }
 0x1bd   : > { %v1346_v42 = vpop.eup %1345  ;;  %v793_v44 = vmul.f32 %v1344_v41, %v1342_v39 }
 0x1be   : > { %v792_v8 = vmul.f32 %v1346_v42, %v791_v40  ;;  %v1348_v50 = vpop.eup %1347 }
 0x1c0   : > { %v794_v46 = vadd.f32 %v793_v44, %v792_v8 }
 0x1c2   : > { %1349 = vtanh.f32 %v794_v46  ;;  %v807_v48 = vmul.f32 %v805_v37, %v794_v46 }
 0x1c4   : > { %v815_v49 = vadd.f32 %v814_v47, %v807_v48 }
 0x1c6   : > { %816 = vst [vmem:[#allocation3] sm:$0xf] %v815_v49 }
 0x1cc   : > { %v1350_v51 = vpop.eup %1349 }
 0x1cd   : > { %v796_v53 = vmul.f32 %v1350_v51, %v1348_v50  ;;  %825 = sbr.rel (%p1033_p10) target bundleno = 850 (0x352), region = 72 }
 0x1cf   : > { %v817_v54 = vmul.f32 %v805_v37, %v796_v53 }
 0x1d1   : > { %v820_v56 = vadd.f32 %v819_v55, %v817_v54 }
 0x1d3   : > { %821 = vst [vmem:[#allocation2] sm:$0xf] %v820_v56 }
 0x1da   : > { %v826_v20 = vld [vmem:[#allocation2] sm:$0xf] }
 0x1db   : > { %1089 = vmatmul.mubr.f32.vlgmr.msra.gmra.mrb[0].mxu0 %v826_v20 }
 0x2ae   : > { %v916_v22 = vpop.f32.mrb[0].mxu0 }
 0x2af   : > { %v917_v23 = vadd.f32 %v1034_v21, %v916_v22  ;;  %v1090_v24 = vpop.f32.mrb[1].mxu0 }
 0x2b1   : > { %v920_v25 = vmul.f32 %v917_v23, %v917_v23 }
 0x2b3   : > { %v922_v26 = vsel %vm921_vm2, %v920_v25, 0.0 }
 0x2b4   : > { %923 = vadd.xlane.f32.xlu0 %v922_v26 }
 0x341   : > { %v924_v27 = vpop.xlane.xlu0 %923 }
 0x342   : > { %v925_v28 = vmax.f32 %v924_v27, 1e-24 }
 0x344   : > { %1351 = vrsqrt.f32 %v925_v28 }
 0x34e   : > { %v1352_v29 = vpop.eup %1351 }
 0x34f   : > { %v927_v30 = vmul.f32 %v1352_v29, %v917_v23 }
 0x351   : > { %928 = vst [vmem:[#allocation12] sm:$0xf] %v927_v30 }
 0x352 PF: > { %p1286_p12 = scmp.eq.s32.totalorder %s1615_s28, 7  ;;  %s1555_s24 = smov [#allocation12]  }
 0x353   : > { %s936_s8 = sshll.u32 %s1555_s24, 4  ;;  %s937_s8 = int_to_ptr.vmem [resolvable:$true] %s936_s8 }
 0x354   : > { %s1467_s23 = scalar_lea.vmem %s937_s8, 64  ;;  %p1474_p9 = scmp.lt.s32.totalorder %s937_s8, %s937_s8 }
 0x355   : > { %p1468_p13 = scmp.ne.s32.totalorder %s937_s8, %s1467_s23  ;;  %p1475_p11 = scmp.lt.s32.totalorder %s1467_s23, %s1467_s23 }
 0x357   : > { %p1469_p0 = pnand %p1468_p13, %p1286_p12  ;;  %p1476_p7 = por %p1475_p11, %p1474_p9 }
 0x359   : > { %p1470_p3 = pneg %p1469_p0 }
 0x35b   : > { %p1477_p2 = pnand %p1476_p7, %p1470_p3 }
 0x35d   : > { %1480 = shalt.err (!%p1477_p2)
}
 0x35e   : > { %s1481_s16 = scalar_lea.hbm %s1849_s7, 64 }
 0x35f   : > { %p1482_p1 = scmp.ne.s32.totalorder %s1849_s7, %s1481_s16  ;;  %p1487_p5 = scmp.lt.u32.totalorder %s1481_s16, %s1849_s7 }
 0x361   : > { %p1483_p8 = pnand %p1482_p1, %p1286_p12 }
 0x363   : > { %p1484_p4 = pneg %p1483_p8 }
 0x365   : > { %p1489_p6 = pnand %p1487_p5, %p1484_p4 }
 0x367   : > { %1492 = shalt.err (!%p1489_p6)
}
 0x368   : > { %1262 = dma.vmem_to_hbm [thread:$0]  (%p1286_p12), %s937_s8, 64, %s1849_s7, [#allocation6]  }
 0x369   : > { %1522 = dma.done.wait (%p1286_p12), [#allocation6], 64  }
 0x36a   : > { %1524 = vsyncadd (%p1286_p12), [#allocation6], 4294967232 }
 0x36b PF: > { %p20_p10 = scmp.ge.s32.totalorder %s1718_s9, 10   ;;  %s1865_s24 = smov %s1531_s25 }
 0x36c   : > { %s1866_s25 = smov %s1535_s26  ;;  %s1867_s26 = smov %s1728_s13 }
 0x36d   : > { %s1868_s27 = smov %s1718_s9  ;;  %22 = sbr.rel (!%p20_p10) target bundleno = 6 (0x6), region = 105 }
 0x374   :  { %949 = vsyncpa [#allocation5], 1 }
 0x375   :  { %951 = vsyncpa [#allocation5 + $0x1], 1 }
 0x376   :  { %952 = vsyncpa [#allocation8], 1 }
 0x377   :  { %953 = vsyncpa [#allocation11], 1 }
 0x378   :  { %954 = vsyncpa [#allocation6], 1 }
 0x379   :  { %956 = vsyncpa [#allocation6 + $0x1], 1 }

</bundles_post_ra>
